<compile_context>
chip_gen: v5e
topology: v5e:2x2
jax: 0.10.0
libtpu: 0.0.40
codegen_flags: <defaults>
</compile_context>

<pallas_src>
import jax
import jax.numpy as jnp
from jax import lax
from jax.experimental import pallas as pl
from jax.experimental.pallas import tpu as pltpu


# ----------------------------------------------------------------------------
# Model dimensions (small, synthetic)
# ----------------------------------------------------------------------------
HOP = 512          # audio samples per mel frame (audio_len // 512 == mel_len)
MEL_LEN = 16       # number of frames
FEAT_DIM = 32      # "text feature" (content) dim
HIDDEN = 64        # conditioning feature dim (folded away at init)
N_MELS = 32        # mel bins produced by the diffusion model
H2 = 64            # denoiser hidden dim
T_STEPS = 4        # diffusion sampler steps
NUM_SPEAKERS = 4

VMEM_SPEC = pl.BlockSpec(memory_space=pltpu.MemorySpace.VMEM)
SMEM_SPEC = pl.BlockSpec(memory_space=pltpu.MemorySpace.SMEM)


# ----------------------------------------------------------------------------
# Fused kernel: pitch -> text features -> conditioning -> diffusion -> vocoder
# ----------------------------------------------------------------------------
def _svc_kernel(pitch_scale_ref,   # SMEM (1,)        f32  2^(pitch_adjust/12)
                alphas_ref,        # SMEM (T_STEPS,)  f32  sampler step sizes
                frames_ref,        # VMEM (MEL_LEN, HOP)      f32
                w_feat_ref,        # VMEM (HOP, FEAT_DIM)     bf16
                b_feat_ref,        # VMEM (1, FEAT_DIM)       f32
                w_cond_ref,        # VMEM (FEAT_DIM, H2)      bf16  (= W_enc @ Wc)
                spk_cond_ref,      # VMEM (1, H2)             f32   (= spk_emb @ Wc)
                wp_cond_ref,       # VMEM (1, H2)             f32   (= w_pitch @ Wc)
                bias_cond_ref,     # VMEM (1, H2)             f32   (= b_pitch @ Wc + b1)
                w1_ref,            # VMEM (N_MELS, H2)        bf16
                w2_ref,            # VMEM (H2, N_MELS)        bf16
                b2_ref,            # VMEM (1, N_MELS)         f32
                w_voc_ref,         # VMEM (N_MELS, HOP)       bf16
                p_voc_ref,         # VMEM (1, HOP)            f32   (0.1 already folded in)
                wav_ref):          # VMEM out (MEL_LEN, HOP)  f32
    frames = frames_ref[...]                                       # one HBM load of audio

    # ---- stage 1: pitch extraction (framed reduction, all f32) -------------
    energy = jnp.mean(jnp.abs(frames), axis=-1, keepdims=True)     # (MEL_LEN, 1)
    raw_pitch = 100.0 + 300.0 * jnp.tanh(energy)
    # early-exit of the reference: "(pitches == 0).all()" (checked pre-adjust).
    # NOTE: with this surrogate (pitch >= 100) it can never fire; kept for
    # semantic fidelity, but off the hot path (see @pl.when at the end).
    all_zero = jnp.all(raw_pitch == 0.0)
    pitch = raw_pitch * pitch_scale_ref[0]                         # pitch_adjust
    log_pitch = jnp.log(jnp.maximum(pitch, 1e-5))                  # (MEL_LEN, 1)

    # ---- stage 2: text features (bf16 MXU matmul, f32 accumulate) ----------
    tf = jnp.tanh(
        jnp.dot(frames.astype(jnp.bfloat16), w_feat_ref[...],
                preferred_element_type=jnp.float32)
        + b_feat_ref[...])                                         # (MEL_LEN, FEAT_DIM)

    # ---- stage 3: folded conditioning  cond_b = features @ Wc + b1 ---------
    #   pitch embedding is a K=1 outer product -> VPU broadcast multiply.
    cond_b = (jnp.dot(tf.astype(jnp.bfloat16), w_cond_ref[...],
                      preferred_element_type=jnp.float32)
              + spk_cond_ref[...]
              + log_pitch * wp_cond_ref[...]
              + bias_cond_ref[...])                                # (MEL_LEN, H2)

    # ---- stage 4: diffusion denoise loop ------------------------------------
    #   loop invariants hoisted; first iteration peeled (x0 == 0 => x0@w1 == 0)
    w1 = w1_ref[...]
    w2 = w2_ref[...]
    b2 = b2_ref[...]

    h0 = jnp.tanh(cond_b)                                          # skip zero matmul
    eps0 = jnp.dot(h0.astype(jnp.bfloat16), w2,
                   preferred_element_type=jnp.float32) + b2
    x1 = -alphas_ref[0] * eps0                                     # (MEL_LEN, N_MELS)

    def step(t, x):
        h = jnp.tanh(jnp.dot(x.astype(jnp.bfloat16), w1,
                             preferred_element_type=jnp.float32) + cond_b)
        eps = jnp.dot(h.astype(jnp.bfloat16), w2,
                      preferred_element_type=jnp.float32) + b2
        return x - alphas_ref[t] * eps

    mel = lax.fori_loop(1, T_STEPS, step, x1, unroll=True)         # (MEL_LEN, N_MELS)

    # ---- stage 5: vocoder spec2wav (lane-dense output, HOP = 512) ----------
    base = jnp.dot(jnp.tanh(mel).astype(jnp.bfloat16), w_voc_ref[...],
                   preferred_element_type=jnp.float32)             # (MEL_LEN, HOP)
    # excitation: K=1 outer product on the VPU; 0.1 scale folded into p_voc.
    wav_ref[...] = jnp.tanh(base + log_pitch * p_voc_ref[...])

    # early-exit semantics of the reference, off the hot path (never fires
    # with this surrogate because raw_pitch >= 100).
    @pl.when(all_zero)
    def _():
        wav_ref[...] = jnp.zeros_like(wav_ref)


def _svc_pallas(pitch_scale, alphas, frames, p):
    # TODO(synk): for realistic mel_len (thousands of frames), tile the frame
    # axis with a grid: BlockSpec((TM, HOP), lambda i: (i, 0)) on frames/wav,
    # constant index_map (lambda i: (0, 0)) + pl.Buffered(1) on the resident
    # weights, dimension_semantics=("parallel",) so v7x's second TensorCore is
    # used, TM ~ 512-1024 with vmem_limit_bytes sized for v7x's 64 MiB VMEM,
    # and bf16 frames/wav streams to halve HBM traffic on v5e/v6e.  At
    # MEL_LEN=16 a single ungridded block is optimal (latency/launch bound).
    return pl.pallas_call(
        _svc_kernel,
        out_shape=jax.ShapeDtypeStruct((MEL_LEN, HOP), jnp.float32),
        in_specs=[SMEM_SPEC, SMEM_SPEC] + [VMEM_SPEC] * 12,
        out_specs=VMEM_SPEC,
    )(pitch_scale, alphas, frames,
      p["w_feat"], p["b_feat"], p["w_cond"], p["spk_cond"], p["wp_cond"],
      p["bias_cond"], p["w1"], p["w2"], p["b2"], p["w_voc"], p["p_voc"])


# ----------------------------------------------------------------------------
# Parameter init (deterministic, synthetic) + algebraic folding
# ----------------------------------------------------------------------------
def init_raw_params(key):
    ks = jax.random.split(key, 10)
    s = lambda k, shape, scale: (scale * jax.random.normal(k, shape)).astype(jnp.float32)
    return {
        "w_feat": s(ks[0], (HOP, FEAT_DIM), 0.05),
        "b_feat": s(ks[1], (1, FEAT_DIM), 0.01),
        "w_enc": s(ks[2], (FEAT_DIM, HIDDEN), 0.1),
        "w_pitch": s(ks[3], (1, HIDDEN), 0.1),
        "b_pitch": s(ks[4], (1, HIDDEN), 0.01),
        "spk_table": s(ks[5], (NUM_SPEAKERS, HIDDEN), 0.1),
        "w1": s(ks[6], (N_MELS, H2), 0.1),
        "wc": s(ks[7], (HIDDEN, H2), 0.1),
        "b1": jnp.zeros((1, H2), jnp.float32),
        "w2": s(ks[8], (H2, N_MELS), 0.1),
        "b2": jnp.zeros((1, N_MELS), jnp.float32),
        "alphas": jnp.linspace(0.5, 0.1, T_STEPS).astype(jnp.float32),
        "w_voc": s(ks[9], (N_MELS, HOP), 0.1),
        "p_voc": jnp.ones((1, HOP), jnp.float32) * 0.01,
    }


def fold_params(raw):
    """Fold the features stage through Wc, fold the 0.1 excitation scale into
    p_voc, and cast all matmul weights to bf16 (f32 accumulation in-kernel)."""
    wc = raw["wc"]
    return {
        "w_feat": raw["w_feat"].astype(jnp.bfloat16),
        "b_feat": raw["b_feat"],
        "w_cond": (raw["w_enc"] @ wc).astype(jnp.bfloat16),            # (FEAT_DIM, H2)
        "spk_cond_table": (raw["spk_table"] @ wc).astype(jnp.float32), # (NUM_SPK, H2)
        "wp_cond": (raw["w_pitch"] @ wc).astype(jnp.float32),          # (1, H2)
        "bias_cond": (raw["b_pitch"] @ wc + raw["b1"]).astype(jnp.float32),
        "w1": raw["w1"].astype(jnp.bfloat16),
        "w2": raw["w2"].astype(jnp.bfloat16),
        "b2": raw["b2"],
        "alphas": raw["alphas"],
        "w_voc": raw["w_voc"].astype(jnp.bfloat16),
        "p_voc": (0.1 * raw["p_voc"]).astype(jnp.float32),             # 0.1 folded in
    }


# ----------------------------------------------------------------------------
# Full SVCInference.forward equivalent (single fused pallas_call)
# ----------------------------------------------------------------------------
@jax.jit
def svc_forward(audio, speakers, params, pitch_adjust=0):
    """audio: (1, L) f32 with L % 512 == 0; speakers: () int32;
    pitch_adjust: traced scalar (no recompile per pitch).  Returns wav (L,)."""
    mel_len = audio.shape[-1] // HOP
    assert mel_len == MEL_LEN
    frames = audio.reshape(mel_len, HOP)                       # (frame, sample)

    pitch_scale = jnp.reshape(
        jnp.exp2(jnp.asarray(pitch_adjust, jnp.float32) / 12.0), (1,))
    # speaker embedding lookup (glue; gather stays in JAX) on the folded table
    spk_cond = params["spk_cond_table"][speakers][None, :]     # (1, H2)

    # TODO(synk): pitch_shift_encoder / energy_encoder branches are disabled in
    # this config (pitch_shift=None, energy=None), so they are not implemented.
    kernel_params = dict(params)
    kernel_params["spk_cond"] = spk_cond
    wav_frames = _svc_pallas(pitch_scale, params["alphas"], frames, kernel_params)
    return wav_frames.reshape(-1)                              # (MEL_LEN * HOP,)


# ----------------------------------------------------------------------------
# Pure-JAX f32 reference (original four-stage pipeline, unfolded params)
# ----------------------------------------------------------------------------
def svc_reference(audio, speakers, raw, pitch_adjust=0):
    frames = audio.reshape(-1, HOP)
    energy = jnp.mean(jnp.abs(frames), axis=-1, keepdims=True)
    pitches = 100.0 + 300.0 * jnp.tanh(energy)
    all_zero = jnp.all(pitches == 0)
    pitches = pitches * (2.0 ** (pitch_adjust / 12.0))
    log_pitch = jnp.log(jnp.maximum(pitches, 1e-5))
    tf = jnp.tanh(frames @ raw["w_feat"] + raw["b_feat"])
    spk = raw["spk_table"][speakers][None, :]
    features = tf @ raw["w_enc"] + spk + log_pitch @ raw["w_pitch"] + raw["b_pitch"]
    cond = features @ raw["wc"]
    x = jnp.zeros((frames.shape[0], N_MELS), jnp.float32)
    for t in range(T_STEPS):
        h = jnp.tanh(x @ raw["w1"] + cond + raw["b1"])
        eps = h @ raw["w2"] + raw["b2"]
        x = x - raw["alphas"][t] * eps
    base = jnp.tanh(x) @ raw["w_voc"]
    excite = log_pitch @ raw["p_voc"]
    wav = jnp.tanh(base + 0.1 * excite).reshape(-1)
    return jnp.where(all_zero, jnp.zeros_like(wav), wav)


if __name__ == "__main__":
    key = jax.random.PRNGKey(0)
    k_audio, k_params = jax.random.split(key)

    audio = jax.random.normal(k_audio, (1, MEL_LEN * HOP), dtype=jnp.float32) * 0.3
    speakers = jnp.int32(0)
    raw_params = init_raw_params(k_params)
    params = fold_params(raw_params)

    wav = svc_forward(audio, speakers, params, pitch_adjust=2)
    wav = jax.block_until_ready(wav)

    assert wav.shape == (MEL_LEN * HOP,)
    assert bool(jnp.all(jnp.isfinite(wav)))

    # correctness vs. pure-JAX f32 reference (bf16 MXU inputs -> loose tol)
    wav_ref = svc_reference(audio, speakers, raw_params, pitch_adjust=2)
    max_err = float(jnp.max(jnp.abs(wav - wav_ref)))
    assert max_err < 5e-2, f"max_err={max_err}"

    print("KERNEL_OK")
</pallas_src>

<mosaic_0001>
module attributes {stable_mosaic.version = 11 : i64} {
  func.func @_svc_kernel(%arg0: memref<1xf32, #tpu.memory_space<smem>>, %arg1: memref<4xf32, #tpu.memory_space<smem>>, %arg2: memref<16x512xf32, #tpu.memory_space<vmem>>, %arg3: memref<512x32xbf16, #tpu.memory_space<vmem>>, %arg4: memref<1x32xf32, #tpu.memory_space<vmem>>, %arg5: memref<32x64xbf16, #tpu.memory_space<vmem>>, %arg6: memref<1x64xf32, #tpu.memory_space<vmem>>, %arg7: memref<1x64xf32, #tpu.memory_space<vmem>>, %arg8: memref<1x64xf32, #tpu.memory_space<vmem>>, %arg9: memref<32x64xbf16, #tpu.memory_space<vmem>>, %arg10: memref<64x32xbf16, #tpu.memory_space<vmem>>, %arg11: memref<1x32xf32, #tpu.memory_space<vmem>>, %arg12: memref<32x512xbf16, #tpu.memory_space<vmem>>, %arg13: memref<1x512xf32, #tpu.memory_space<vmem>>, %arg14: memref<16x512xf32, #tpu.memory_space<vmem>>) attributes {dimension_semantics = [], scalar_prefetch = 0 : i64, scratch_operands = 0 : i64, tpu.core_type = #tpu.core_type<tc>} {
    %c0 = arith.constant 0 : index
    %c0_0 = arith.constant 0 : index
    %0 = vector.load %arg2[%c0, %c0_0] : memref<16x512xf32, #tpu.memory_space<vmem>>, vector<16x512xf32>
    %1 = math.absf %0 : vector<16x512xf32>
    %cst = arith.constant dense<0.000000e+00> : vector<16xf32>
    %2 = vector.multi_reduction <add>, %1, %cst [1] : vector<16x512xf32> to vector<16xf32>
    %3 = vector.shape_cast %2 : vector<16xf32> to vector<16x1xf32>
    %cst_1 = arith.constant 5.120000e+02 : f32
    %4 = vector.broadcast %cst_1 : f32 to vector<16x1xf32>
    %5 = arith.divf %3, %4 : vector<16x1xf32>
    %6 = math.tanh %5 : vector<16x1xf32>
    %cst_2 = arith.constant 3.000000e+02 : f32
    %7 = vector.broadcast %cst_2 : f32 to vector<16x1xf32>
    %8 = arith.mulf %7, %6 : vector<16x1xf32>
    %cst_3 = arith.constant 1.000000e+02 : f32
    %9 = vector.broadcast %cst_3 : f32 to vector<16x1xf32>
    %10 = arith.addf %9, %8 : vector<16x1xf32>
    %cst_4 = arith.constant 0.000000e+00 : f32
    %11 = vector.broadcast %cst_4 : f32 to vector<16x1xf32>
    %12 = arith.cmpf oeq, %10, %11 : vector<16x1xf32>
    %cst_5 = arith.constant 1.000000e+00 : f32
    %cst_6 = arith.constant 0.000000e+00 : f32
    %13 = vector.broadcast %cst_5 : f32 to vector<16x1xf32>
    %14 = vector.broadcast %cst_6 : f32 to vector<16x1xf32>
    %15 = arith.select %12, %13, %14 : vector<16x1xi1>, vector<16x1xf32>
    %16 = vector.shape_cast %15 : vector<16x1xf32> to vector<1x16x1xf32>
    %cst_7 = arith.constant dense<0x7F800000> : vector<1xf32>
    %17 = vector.multi_reduction <minimumf>, %16, %cst_7 [1, 2] : vector<1x16x1xf32> to vector<1xf32>
    %18 = vector.shape_cast %17 : vector<1xf32> to vector<1x1x1xf32>
    %19 = vector.extract %18[0, 0, 0] : f32 from vector<1x1x1xf32>
    %cst_8 = arith.constant 0.000000e+00 : f32
    %20 = arith.cmpf ogt, %19, %cst_8 : f32
    %c0_9 = arith.constant 0 : index
    %21 = memref.load %arg0[%c0_9] : memref<1xf32, #tpu.memory_space<smem>>
    %22 = vector.broadcast %21 : f32 to vector<16x1xf32>
    %23 = arith.mulf %10, %22 : vector<16x1xf32>
    %cst_10 = arith.constant 9.99999974E-6 : f32
    %24 = vector.broadcast %cst_10 : f32 to vector<16x1xf32>
    %25 = arith.maximumf %23, %24 : vector<16x1xf32>
    %26 = math.log %25 : vector<16x1xf32>
    %27 = arith.truncf %0 : vector<16x512xf32> to vector<16x512xbf16>
    %c0_11 = arith.constant 0 : index
    %c0_12 = arith.constant 0 : index
    %28 = vector.load %arg3[%c0_11, %c0_12] : memref<512x32xbf16, #tpu.memory_space<vmem>>, vector<512x32xbf16>
    %cst_13 = arith.constant dense<0.000000e+00> : vector<16x32xf32>
    %29 = tpu.matmul %27, %28, %cst_13 {dimension_numbers = #tpu.dot_dimension_numbers<[1], [0], [0], [1], [0, 0, 1, 1], [], []>} : vector<16x512xbf16>, vector<512x32xbf16>, vector<16x32xf32> -> vector<16x32xf32>
    %c0_14 = arith.constant 0 : index
    %c0_15 = arith.constant 0 : index
    %30 = vector.load %arg4[%c0_14, %c0_15] : memref<1x32xf32, #tpu.memory_space<vmem>>, vector<1x32xf32>
    %31 = vector.broadcast %30 : vector<1x32xf32> to vector<16x32xf32>
    %32 = arith.addf %29, %31 : vector<16x32xf32>
    %33 = math.tanh %32 : vector<16x32xf32>
    %34 = arith.truncf %33 : vector<16x32xf32> to vector<16x32xbf16>
    %c0_16 = arith.constant 0 : index
    %c0_17 = arith.constant 0 : index
    %35 = vector.load %arg5[%c0_16, %c0_17] : memref<32x64xbf16, #tpu.memory_space<vmem>>, vector<32x64xbf16>
    %cst_18 = arith.constant dense<0.000000e+00> : vector<16x64xf32>
    %36 = tpu.matmul %34, %35, %cst_18 {dimension_numbers = #tpu.dot_dimension_numbers<[1], [0], [0], [1], [0, 0, 1, 1], [], []>} : vector<16x32xbf16>, vector<32x64xbf16>, vector<16x64xf32> -> vector<16x64xf32>
    %c0_19 = arith.constant 0 : index
    %c0_20 = arith.constant 0 : index
    %37 = vector.load %arg6[%c0_19, %c0_20] : memref<1x64xf32, #tpu.memory_space<vmem>>, vector<1x64xf32>
    %38 = vector.broadcast %37 : vector<1x64xf32> to vector<16x64xf32>
    %39 = arith.addf %36, %38 : vector<16x64xf32>
    %c0_21 = arith.constant 0 : index
    %c0_22 = arith.constant 0 : index
    %40 = vector.load %arg7[%c0_21, %c0_22] : memref<1x64xf32, #tpu.memory_space<vmem>>, vector<1x64xf32>
    %41 = vector.broadcast %26 : vector<16x1xf32> to vector<16x64xf32>
    %42 = vector.broadcast %40 : vector<1x64xf32> to vector<16x64xf32>
    %43 = arith.mulf %41, %42 : vector<16x64xf32>
    %44 = arith.addf %39, %43 : vector<16x64xf32>
    %c0_23 = arith.constant 0 : index
    %c0_24 = arith.constant 0 : index
    %45 = vector.load %arg8[%c0_23, %c0_24] : memref<1x64xf32, #tpu.memory_space<vmem>>, vector<1x64xf32>
    %46 = vector.broadcast %45 : vector<1x64xf32> to vector<16x64xf32>
    %47 = arith.addf %44, %46 : vector<16x64xf32>
    %c0_25 = arith.constant 0 : index
    %c0_26 = arith.constant 0 : index
    %48 = vector.load %arg9[%c0_25, %c0_26] : memref<32x64xbf16, #tpu.memory_space<vmem>>, vector<32x64xbf16>
    %c0_27 = arith.constant 0 : index
    %c0_28 = arith.constant 0 : index
    %49 = vector.load %arg10[%c0_27, %c0_28] : memref<64x32xbf16, #tpu.memory_space<vmem>>, vector<64x32xbf16>
    %c0_29 = arith.constant 0 : index
    %c0_30 = arith.constant 0 : index
    %50 = vector.load %arg11[%c0_29, %c0_30] : memref<1x32xf32, #tpu.memory_space<vmem>>, vector<1x32xf32>
    %51 = math.tanh %47 : vector<16x64xf32>
    %52 = arith.truncf %51 : vector<16x64xf32> to vector<16x64xbf16>
    %cst_31 = arith.constant dense<0.000000e+00> : vector<16x32xf32>
    %53 = tpu.matmul %52, %49, %cst_31 {dimension_numbers = #tpu.dot_dimension_numbers<[1], [0], [0], [1], [0, 0, 1, 1], [], []>} : vector<16x64xbf16>, vector<64x32xbf16>, vector<16x32xf32> -> vector<16x32xf32>
    %54 = vector.broadcast %50 : vector<1x32xf32> to vector<16x32xf32>
    %55 = arith.addf %53, %54 : vector<16x32xf32>
    %c0_32 = arith.constant 0 : index
    %56 = memref.load %arg1[%c0_32] : memref<4xf32, #tpu.memory_space<smem>>
    %cst_33 = arith.constant 0.000000e+00 : f32
    %57 = arith.subf %cst_33, %56 : f32
    %58 = vector.broadcast %57 : f32 to vector<16x32xf32>
    %59 = arith.mulf %58, %55 : vector<16x32xf32>
    %c1_i32 = arith.constant 1 : i32
    %60 = arith.truncf %59 : vector<16x32xf32> to vector<16x32xbf16>
    %cst_34 = arith.constant dense<0.000000e+00> : vector<16x64xf32>
    %61 = tpu.matmul %60, %48, %cst_34 {dimension_numbers = #tpu.dot_dimension_numbers<[1], [0], [0], [1], [0, 0, 1, 1], [], []>} : vector<16x32xbf16>, vector<32x64xbf16>, vector<16x64xf32> -> vector<16x64xf32>
    %62 = arith.addf %61, %47 : vector<16x64xf32>
    %63 = math.tanh %62 : vector<16x64xf32>
    %64 = arith.truncf %63 : vector<16x64xf32> to vector<16x64xbf16>
    %cst_35 = arith.constant dense<0.000000e+00> : vector<16x32xf32>
    %65 = tpu.matmul %64, %49, %cst_35 {dimension_numbers = #tpu.dot_dimension_numbers<[1], [0], [0], [1], [0, 0, 1, 1], [], []>} : vector<16x64xbf16>, vector<64x32xbf16>, vector<16x32xf32> -> vector<16x32xf32>
    %66 = vector.broadcast %50 : vector<1x32xf32> to vector<16x32xf32>
    %67 = arith.addf %65, %66 : vector<16x32xf32>
    %68 = arith.index_cast %c1_i32 : i32 to index
    %69 = memref.load %arg1[%68] : memref<4xf32, #tpu.memory_space<smem>>
    %70 = vector.broadcast %69 : f32 to vector<16x32xf32>
    %71 = arith.mulf %70, %67 : vector<16x32xf32>
    %72 = arith.subf %59, %71 : vector<16x32xf32>
    %c2_i32 = arith.constant 2 : i32
    %73 = arith.truncf %72 : vector<16x32xf32> to vector<16x32xbf16>
    %cst_36 = arith.constant dense<0.000000e+00> : vector<16x64xf32>
    %74 = tpu.matmul %73, %48, %cst_36 {dimension_numbers = #tpu.dot_dimension_numbers<[1], [0], [0], [1], [0, 0, 1, 1], [], []>} : vector<16x32xbf16>, vector<32x64xbf16>, vector<16x64xf32> -> vector<16x64xf32>
    %75 = arith.addf %74, %47 : vector<16x64xf32>
    %76 = math.tanh %75 : vector<16x64xf32>
    %77 = arith.truncf %76 : vector<16x64xf32> to vector<16x64xbf16>
    %cst_37 = arith.constant dense<0.000000e+00> : vector<16x32xf32>
    %78 = tpu.matmul %77, %49, %cst_37 {dimension_numbers = #tpu.dot_dimension_numbers<[1], [0], [0], [1], [0, 0, 1, 1], [], []>} : vector<16x64xbf16>, vector<64x32xbf16>, vector<16x32xf32> -> vector<16x32xf32>
    %79 = vector.broadcast %50 : vector<1x32xf32> to vector<16x32xf32>
    %80 = arith.addf %78, %79 : vector<16x32xf32>
    %81 = arith.index_cast %c2_i32 : i32 to index
    %82 = memref.load %arg1[%81] : memref<4xf32, #tpu.memory_space<smem>>
    %83 = vector.broadcast %82 : f32 to vector<16x32xf32>
    %84 = arith.mulf %83, %80 : vector<16x32xf32>
    %85 = arith.subf %72, %84 : vector<16x32xf32>
    %c3_i32 = arith.constant 3 : i32
    %86 = arith.truncf %85 : vector<16x32xf32> to vector<16x32xbf16>
    %cst_38 = arith.constant dense<0.000000e+00> : vector<16x64xf32>
    %87 = tpu.matmul %86, %48, %cst_38 {dimension_numbers = #tpu.dot_dimension_numbers<[1], [0], [0], [1], [0, 0, 1, 1], [], []>} : vector<16x32xbf16>, vector<32x64xbf16>, vector<16x64xf32> -> vector<16x64xf32>
    %88 = arith.addf %87, %47 : vector<16x64xf32>
    %89 = math.tanh %88 : vector<16x64xf32>
    %90 = arith.truncf %89 : vector<16x64xf32> to vector<16x64xbf16>
    %cst_39 = arith.constant dense<0.000000e+00> : vector<16x32xf32>
    %91 = tpu.matmul %90, %49, %cst_39 {dimension_numbers = #tpu.dot_dimension_numbers<[1], [0], [0], [1], [0, 0, 1, 1], [], []>} : vector<16x64xbf16>, vector<64x32xbf16>, vector<16x32xf32> -> vector<16x32xf32>
    %92 = vector.broadcast %50 : vector<1x32xf32> to vector<16x32xf32>
    %93 = arith.addf %91, %92 : vector<16x32xf32>
    %94 = arith.index_cast %c3_i32 : i32 to index
    %95 = memref.load %arg1[%94] : memref<4xf32, #tpu.memory_space<smem>>
    %96 = vector.broadcast %95 : f32 to vector<16x32xf32>
    %97 = arith.mulf %96, %93 : vector<16x32xf32>
    %98 = arith.subf %85, %97 : vector<16x32xf32>
    %c3_i32_40 = arith.constant 3 : i32
    %99 = math.tanh %98 : vector<16x32xf32>
    %100 = arith.truncf %99 : vector<16x32xf32> to vector<16x32xbf16>
    %c0_41 = arith.constant 0 : index
    %c0_42 = arith.constant 0 : index
    %101 = vector.load %arg12[%c0_41, %c0_42] : memref<32x512xbf16, #tpu.memory_space<vmem>>, vector<32x512xbf16>
    %cst_43 = arith.constant dense<0.000000e+00> : vector<16x512xf32>
    %102 = tpu.matmul %100, %101, %cst_43 {dimension_numbers = #tpu.dot_dimension_numbers<[1], [0], [0], [1], [0, 0, 1, 1], [], []>} : vector<16x32xbf16>, vector<32x512xbf16>, vector<16x512xf32> -> vector<16x512xf32>
    %c0_44 = arith.constant 0 : index
    %c0_45 = arith.constant 0 : index
    %103 = vector.load %arg13[%c0_44, %c0_45] : memref<1x512xf32, #tpu.memory_space<vmem>>, vector<1x512xf32>
    %104 = vector.broadcast %26 : vector<16x1xf32> to vector<16x512xf32>
    %105 = vector.broadcast %103 : vector<1x512xf32> to vector<16x512xf32>
    %106 = arith.mulf %104, %105 : vector<16x512xf32>
    %107 = arith.addf %102, %106 : vector<16x512xf32>
    %108 = math.tanh %107 : vector<16x512xf32>
    %c0_46 = arith.constant 0 : index
    %c0_47 = arith.constant 0 : index
    %109 = vector.load %arg14[%c0_46, %c0_47] : memref<16x512xf32, #tpu.memory_space<vmem>>, vector<16x512xf32>
    tpu.vector_store %arg14[%c0_46, %c0_47], %108 {strides = array<i32>} : memref<16x512xf32, #tpu.memory_space<vmem>>, vector<16x512xf32>,
    %110 = arith.extui %20 : i1 to i32
    %c0_i32 = arith.constant 0 : i32
    %111 = arith.cmpi ne, %110, %c0_i32 : i32
    scf.if %111 {
      %cst_48 = arith.constant 0.000000e+00 : f32
      %112 = vector.broadcast %cst_48 : f32 to vector<16x512xf32>
      %c0_49 = arith.constant 0 : index
      %c0_50 = arith.constant 0 : index
      %113 = vector.load %arg14[%c0_49, %c0_50] : memref<16x512xf32, #tpu.memory_space<vmem>>, vector<16x512xf32>
      tpu.vector_store %arg14[%c0_49, %c0_50], %112 {strides = array<i32>} : memref<16x512xf32, #tpu.memory_space<vmem>>, vector<16x512xf32>,
    } else {
    }
    return
  }
}

</mosaic_0001>

<bundles_post_ra>
// kernel: svc_forward.1
= control target key start
LH: loop header
LB: loop body
LE: loop exit
PB: predicated region body
PF: predicated region fallthrough
CT: control target
= control target key end

     0   :  { %20 = vsyncpa [#allocation4], 0  ;;  %s1201_s16 = smov [#allocation3]   ;;  %s1597_s0 = inlined_call_operand.<no memory space> [shape: f32[1], index: 0, kind: input, shape index: {}]   ;;  %s1598_s1 = inlined_call_operand.vmem [shape: f32[4], index: 1, kind: input, shape index: {}]   ;;  %s1599_s2 = inlined_call_operand.vmem [shape: f32[16,512], index: 2, kind: input, shape index: {}]   ;;  %s1600_s3 = inlined_call_operand.vmem [shape: bf16[512,32], index: 3, kind: input, shape index: {}]   ;;  %s1601_s4 = inlined_call_operand.vmem [shape: f32[1,32], index: 4, kind: input, shape index: {}]   ;;  %s1602_s5 = inlined_call_operand.vmem [shape: bf16[32,64], index: 5, kind: input, shape index: {}]   ;;  %s1603_s6 = inlined_call_operand.vmem [shape: f32[1,64], index: 6, kind: input, shape index: {}]   ;;  %s1604_s7 = inlined_call_operand.vmem [shape: f32[1,64], index: 7, kind: input, shape index: {}]   ;;  %s1605_s8 = inlined_call_operand.vmem [shape: f32[1,64], index: 8, kind: input, shape index: {}]   ;;  %s1606_s9 = inlined_call_operand.vmem [shape: bf16[32,64], index: 9, kind: input, shape index: {}]   ;;  %s1607_s10 = inlined_call_operand.vmem [shape: bf16[64,32], index: 10, kind: input, shape index: {}]   ;;  %s1608_s11 = inlined_call_operand.vmem [shape: f32[1,32], index: 11, kind: input, shape index: {}]   ;;  %s1609_s12 = inlined_call_operand.vmem [shape: bf16[32,512], index: 12, kind: input, shape index: {}]   ;;  %s1610_s13 = inlined_call_operand.vmem [shape: f32[1,512], index: 13, kind: input, shape index: {}]   ;;  %s1611_s14 = inlined_call_operand.vmem [shape: f32[16,512], index: 14, kind: output, shape index: {}]  }
   0x1   :  { %s28_s15 = sshll.u32 %s1598_s1, 4  ;;  %s29_s15 = int_to_ptr.vmem [resolvable:$true] %s28_s15 }
   0x2   :  { %31 = dma.vmem_to_smem %s29_s15, 16, %s1201_s16, [#allocation4]  }
   0x3   :  { %1199 = dma.done.wait [#allocation4], 16  }
   0x4   :  { %1200 = vsyncadd [#allocation4], 4294967280 }
   0x5   :  { %60 = sfence }
   0x6   :  { %v1085_v0 = vld [vmem:[%s1600_s3 + $0x38] sm:$0xff]  ;;  %v1084_v4 = vld [vmem:[%s1600_s3 + $0x30] sm:$0xff]  ;;  %v1083_v8 = vld [vmem:[%s1600_s3 + $0x28] sm:$0xff]  ;;  %vm469_vm0 = vcmask 261120   ;;  %vm544_vm4 = vcmask 523264   ;;  %s1041_s18 = sld [smem:[#allocation3 + $0x3]] }
   0x7   :  { %v1093_v1 = vld [vmem:[%s1600_s3 + $0x78] sm:$0xff]  ;;  %390 = vmatpush.bf16.msra.mxu0 %v1085_v0  ;;  %v1092_v5 = vld [vmem:[%s1600_s3 + $0x70] sm:$0xff]  ;;  %v1091_v9 = vld [vmem:[%s1600_s3 + $0x68] sm:$0xff] }
   0x8   :  { %v1101_v2 = vld [vmem:[%s1600_s3 + $0xb8] sm:$0xff]  ;;  %404 = vmatpush.bf16.msra.mxu1 %v1093_v1  ;;  %v1100_v6 = vld [vmem:[%s1600_s3 + $0xb0] sm:$0xff]  ;;  %v1099_v10 = vld [vmem:[%s1600_s3 + $0xa8] sm:$0xff] }
   0x9   :  { %v1109_v3 = vld [vmem:[%s1600_s3 + $0xf8] sm:$0xff]  ;;  %418 = vmatpush.bf16.msra.mxu2 %v1101_v2  ;;  %v1108_v7 = vld [vmem:[%s1600_s3 + $0xf0] sm:$0xff]  ;;  %v1107_v11 = vld [vmem:[%s1600_s3 + $0xe8] sm:$0xff] }
   0xa   :  { %432 = vmatpush.bf16.msra.mxu3 %v1109_v3  ;;  %v1082_v12 = vld [vmem:[%s1600_s3 + $0x20] sm:$0xff]  ;;  %v63_v18 = vld [vmem:[%s1599_s2 + $0x8] sm:$0xff]  ;;  %v64_v20 = vld [vmem:[%s1599_s2 + $0x10] sm:$0xff] }
   0xb   :  { %391 = vmatpush.bf16.msra.mxu0 %v1084_v4  ;;  %v1090_v13 = vld [vmem:[%s1600_s3 + $0x60] sm:$0xff]  ;;  %v71_v19 = vand.u32 2147483647, %v63_v18  ;;  %v1081_v21 = vld [vmem:[%s1600_s3 + $0x18] sm:$0xff]  ;;  %v72_v23 = vand.u32 2147483647, %v64_v20 }
   0xc   :  { %405 = vmatpush.bf16.msra.mxu1 %v1092_v5  ;;  %v62_v14 = vld [vmem:[%s1599_s2] sm:$0xff]  ;;  %v1089_v22 = vld [vmem:[%s1600_s3 + $0x58] sm:$0xff]  ;;  %v1080_v30 = vld [vmem:[%s1600_s3 + $0x10] sm:$0xff] }
   0xd   :  { %419 = vmatpush.bf16.msra.mxu2 %v1100_v6  ;;  %v1098_v15 = vld [vmem:[%s1600_s3 + $0xa0] sm:$0xff]  ;;  %v70_v17 = vand.u32 2147483647, %v62_v14  ;;  %v65_v24 = vld [vmem:[%s1599_s2 + $0x18] sm:$0xff]  ;;  %v1088_v31 = vld [vmem:[%s1600_s3 + $0x50] sm:$0xff] }
   0xe   :  { %433 = vmatpush.bf16.msra.mxu3 %v1108_v7  ;;  %v1106_v16 = vld [vmem:[%s1600_s3 + $0xe0] sm:$0xff]  ;;  %v1097_v26 = vld [vmem:[%s1600_s3 + $0x98] sm:$0xff]  ;;  %v73_v28 = vand.u32 2147483647, %v65_v24  ;;  %v1096_v33 = vld [vmem:[%s1600_s3 + $0x90] sm:$0xff] }
   0xf   :  { %392 = vmatpush.bf16.msra.mxu0 %v1083_v8  ;;  %v78_v25 = vadd.f32 %v71_v19, %v70_v17  ;;  %v1105_v27 = vld [vmem:[%s1600_s3 + $0xd8] sm:$0xff]  ;;  %v1104_v34 = vld [vmem:[%s1600_s3 + $0xd0] sm:$0xff]  ;;  %v1079_v35 = vld [vmem:[%s1600_s3 + $0x8] sm:$0xff] }
  0x10   :  { %406 = vmatpush.bf16.msra.mxu1 %v1091_v9  ;;  %v1087_v36 = vld [vmem:[%s1600_s3 + $0x48] sm:$0xff]  ;;  %v1078_v39 = vld [vmem:[%s1600_s3] sm:$0xff]  ;;  %v68_v45 = vld [vmem:[%s1599_s2 + $0x30] sm:$0xff] }
  0x11   :  { %420 = vmatpush.bf16.msra.mxu2 %v1099_v10  ;;  %v79_v29 = vadd.f32 %v78_v25, %v72_v23  ;;  %v1095_v37 = vld [vmem:[%s1600_s3 + $0x88] sm:$0xff]  ;;  %v1086_v40 = vld [vmem:[%s1600_s3 + $0x40] sm:$0xff]  ;;  %v69_v46 = vld [vmem:[%s1599_s2 + $0x38] sm:$0xff]  ;;  %v128_v49 = vpack.c.bf16 %v68_v45, %v64_v20  ;;  %v76_v53 = vand.u32 2147483647, %v68_v45 }
  0x12   :  { %434 = vmatpush.bf16.msra.mxu3 %v1107_v11  ;;  %v1103_v38 = vld [vmem:[%s1600_s3 + $0xc8] sm:$0xff]  ;;  %v1094_v41 = vld [vmem:[%s1600_s3 + $0x80] sm:$0xff]  ;;  %v129_v50 = vpack.c.bf16 %v69_v46, %v65_v24  ;;  %v77_v55 = vand.u32 2147483647, %v69_v46  ;;  %v1116_v45 = vld [vmem:[%s1607_s10 + $0x10] sm:$0xff] }
  0x13   :  { %393 = vmatpush.bf16.msra.mxu0 %v1082_v12  ;;  %v80_v32 = vadd.f32 %v79_v29, %v73_v28  ;;  %v66_v42 = vld [vmem:[%s1599_s2 + $0x20] sm:$0xff]  ;;  %v67_v43 = vld [vmem:[%s1599_s2 + $0x28] sm:$0xff] }
  0x14   :  { %407 = vmatpush.bf16.msra.mxu1 %v1090_v13  ;;  %v1102_v44 = vld [vmem:[%s1600_s3 + $0xc0] sm:$0xff]  ;;  %v126_v47 = vpack.c.bf16 %v66_v42, %v62_v14  ;;  %v127_v48 = vpack.c.bf16 %v67_v43, %v63_v18  ;;  %v74_v51 = vand.u32 2147483647, %v66_v42  ;;  %v75_v52 = vand.u32 2147483647, %v67_v43  ;;  %v1111_v58 = vld [vmem:[%s1602_s5 + $0x8] sm:$0xff] }
  0x15   :  { %421 = vmatpush.bf16.msra.mxu2 %v1098_v15  ;;  %81 = vadd.xlane.f32.xlu0 %v80_v32  ;;  %v1110_v59 = vld [vmem:[%s1602_s5] sm:$0xff]  ;;  %v1117_v43 = vld [vmem:[%s1607_s10 + $0x18] sm:$0xff]  ;;  %s562_s3 = sld [smem:[#allocation3]] }
  0x16   :  { %435 = vmatpush.bf16.msra.mxu3 %v1106_v16  ;;  %v83_v54 = vadd.f32 %v75_v52, %v74_v51  ;;  %v1132_v60 = vld [vmem:[%s1601_s4] ss:$0 sm:$0xff]  ;;  %v1202_v16 = vmov 512.0   ;;  %v1113_v52 = vld [vmem:[%s1606_s9 + $0x8] sm:$0xff] }
  0x17   :  { %394 = vmatpush.bf16.msra.mxu0 %v1081_v21 }
  0x18   :  { %408 = vmatpush.bf16.msra.mxu1 %v1089_v22  ;;  %v84_v56 = vadd.f32 %v83_v54, %v76_v53 }
  0x19   :  { %422 = vmatpush.bf16.msra.mxu2 %v1097_v26 }
  0x1a   :  { %436 = vmatpush.bf16.msra.mxu3 %v1105_v27  ;;  %v85_v57 = vadd.f32 %v84_v56, %v77_v55  ;;  %v1133_v55 = vld [vmem:[%s1603_s6] ss:$0 sm:$0xff] }
  0x1b   :  { %395 = vmatpush.bf16.msra.mxu0 %v1080_v30  ;;  %v1134_v56 = vld [vmem:[%s1604_s7] ss:$0 sm:$0xff]  ;;  %s563_s30 = ssub.f32 0.0, %s562_s3 }
  0x1c   :  { %409 = vmatpush.bf16.msra.mxu1 %v1088_v31 }
  0x1d   :  { %423 = vmatpush.bf16.msra.mxu2 %v1096_v33  ;;  %86 = vadd.xlane.f32.xlu0 %v85_v57  ;;  %v1203_v33 = vmov 0.0  }
  0x1e   :  { %437 = vmatpush.bf16.msra.mxu3 %v1104_v34 }
  0x1f   :  { %396 = vmatpush.bf16.msra.mxu0 %v1079_v35 }
  0x20   :  { %410 = vmatpush.bf16.msra.mxu1 %v1087_v36 }
  0x21   :  { %424 = vmatpush.bf16.msra.mxu2 %v1095_v37 }
  0x22   :  { %438 = vmatpush.bf16.msra.mxu3 %v1103_v38 }
  0x23   :  { %397 = vmatpush.bf16.msra.mxu0 %v1078_v39 }
  0x24   :  { %411 = vmatpush.bf16.msra.mxu1 %v1086_v40 }
  0x25   :  { %425 = vmatpush.bf16.msra.mxu2 %v1094_v41 }
  0x26   :  { %439 = vmatpush.bf16.msra.mxu3 %v1102_v44  ;;  %398 = vmatmul.bf16.vlgmr.msra.gmra.mxu0 %v126_v47  ;;  %v117_v44 = vstv %s1597_s0  ;;  %v1115_v47 = vld [vmem:[%s1607_s10 + $0x8] sm:$0xff] }
  0x27   :  { %412 = vmatmul.bf16.vlgmr.msra.gmra.mxu1 %v127_v48  ;;  %479 = vmatpush.bf16.msrb.mxu0 %v1111_v58 }
  0x28   :  { %426 = vmatmul.bf16.vlgmr.msra.gmra.mxu2 %v128_v49  ;;  %552 = vmatpush.bf16.msrb.mxu1 %v1117_v43  ;;  %v1114_v49 = vld [vmem:[%s1607_s10] sm:$0xff] }
  0x29   :  { %440 = vmatmul.bf16.vlgmr.msra.gmra.mxu3 %v129_v50  ;;  %589 = vmatpush.bf16.msrb.mxu2 %v1113_v52 }
  0x2a   :  { %607 = vmatpush.bf16.msrb.mxu3 %v1117_v43 }
  0x2b   :  { %480 = vmatpush.bf16.msrb.mxu0 %v1110_v59 }
  0x2c   :  { %553 = vmatpush.bf16.msrb.mxu1 %v1116_v45 }
  0x2e   :  { %608 = vmatpush.bf16.msrb.mxu3 %v1116_v45 }
  0x2f   :  { %633 = vmatpush.bf16.msra.mxu0 %v1113_v52 }
  0x30   :  { %554 = vmatpush.bf16.msrb.mxu1 %v1115_v47 }
  0x32   :  { %609 = vmatpush.bf16.msrb.mxu3 %v1115_v47 }
  0x34   :  { %555 = vmatpush.bf16.msrb.mxu1 %v1114_v49 }
  0x36   :  { %610 = vmatpush.bf16.msrb.mxu3 %v1114_v49 }
  0x38   :  { %651 = vmatpush.bf16.msra.mxu1 %v1117_v43 }
  0x3a   :  { %695 = vmatpush.bf16.msra.mxu3 %v1117_v43 }
  0x3c   :  { %652 = vmatpush.bf16.msra.mxu1 %v1116_v45 }
  0x3e   :  { %696 = vmatpush.bf16.msra.mxu3 %v1116_v45 }
  0x40   :  { %653 = vmatpush.bf16.msra.mxu1 %v1115_v47 }
  0x42   :  { %697 = vmatpush.bf16.msra.mxu3 %v1115_v47 }
  0x44   :  { %654 = vmatpush.bf16.msra.mxu1 %v1114_v49 }
  0x46   :  { %698 = vmatpush.bf16.msra.mxu3 %v1114_v49 }
  0x88   :  { %v82_v23 = vpop.xlane.xlu0 %81 }
  0x90   :  { %v87_v26 = vpop.xlane.xlu0 %86 }
  0xa3   :  { %v399_v61 = vpop.f32.mrf.mxu0 }
  0xa4   :  { %v400_v62 = vadd.f32 %v1132_v60, %v399_v61  ;;  %v413_v63 = vpop.f32.mrf.mxu1 }
  0xa6   :  { %v414_v0 = vadd.f32 %v413_v63, %v400_v62  ;;  %v1135_v63 = vld [vmem:[%s1605_s8] ss:$0 sm:$0xff] }
  0xab   :  { %v427_v1 = vpop.f32.mrf.mxu2  ;;  %v401_v3 = vpop.f32.mrf.mxu0 }
  0xac   :  { %v441_v2 = vpop.f32.mrf.mxu3  ;;  %v402_v4 = vadd.f32 %v1132_v60, %v401_v3  ;;  %v428_v5 = vadd.f32 %v427_v1, %v414_v0  ;;  %v415_v6 = vpop.f32.mrf.mxu1 }
  0xae   :  { %v416_v7 = vadd.f32 %v415_v6, %v402_v4  ;;  %v442_v8 = vadd.f32 %v441_v2, %v428_v5 }
  0xb0   :  { %1137 = vtanh.f32 %v442_v8 }
  0xb3   :  { %v429_v9 = vpop.f32.mrf.mxu2 }
  0xb4   :  { %v430_v10 = vadd.f32 %v429_v9, %v416_v7  ;;  %v443_v11 = vpop.f32.mrf.mxu3  ;;  %v1112_v9 = vld [vmem:[%s1606_s9] sm:$0xff]  ;;  %s1035_s9 = sld [smem:[#allocation3 + $0x1]] }
  0xb5   :  { %590 = vmatpush.bf16.msrb.mxu2 %v1112_v9  ;;  %634 = vmatpush.bf16.msra.mxu0 %v1112_v9 }
  0xb6   :  { %v444_v12 = vadd.f32 %v443_v11, %v430_v10  ;;  %v1138_v13 = vpop.eup %1137  ;;  %v1462_v11 = vld [vmem:[%s1608_s11] ss:$0 sm:$0xff]  ;;  %s1038_s11 = sld [smem:[#allocation3 + $0x2]] }
  0xb8   :  { %1139 = vtanh.f32 %v444_v12 }
  0xb9   :  { %1141 = vrcp.f32 %v1202_v16  ;;  %677 = vmatpush.bf16.msra.mxu2 %v1113_v52 }
  0xbc   :  { %v662_v45 = vstv %s1038_s11 }
  0xbd   :  { %678 = vmatpush.bf16.msra.mxu2 %v1112_v9  ;;  %v1052_v9 = vld [vmem:[%s1609_s12 + $0x8] sm:$0xf] }
  0xbe   :  { %v1140_v14 = vpop.eup %1139 }
  0xbf   :  { %v448_v15 = vpack.c.bf16 %v1140_v14, %v1138_v13  ;;  %v1142_v17 = vpop.eup %1141  ;;  %v564_v13 = vstv %s563_s30 }
  0xc0   :  { %v89_v18 = vmul.f32 512.0, %v1142_v17  ;;  %vm93_vm1 = vweird.f32 %v1142_v17 }
  0xc1   :  { %1007 = vmatmul.msk.bf16.vlgmr.msrb.gmra.mxu0 %vm469_vm0, %v448_v15 }
  0xc2   :  { %v90_v19 = vsub.f32 1.0, %v89_v18 }
  0xc4   :  { %v91_v20 = vmul.f32 %v1142_v17, %v90_v19 }
  0xc6   :  { %v92_v21 = vadd.f32 %v1142_v17, %v91_v20 }
  0xc8   :  { %v94_v22 = vsel %vm93_vm1, %v1142_v17, %v92_v21 }
  0xc9   :  { %v95_v24 = vmul.f32 %v94_v22, %v82_v23  ;;  %v96_v27 = vmul.f32 %v94_v22, %v87_v26 }
  0xcb   :  { %1143 = vtanh.f32 %v95_v24 }
  0xcc   :  { %1145 = vtanh.f32 %v96_v27 }
  0xd1   :  { %v1144_v25 = vpop.eup %1143 }
  0xd2   :  { %v99_v28 = vmul.f32 300.0, %v1144_v25  ;;  %v1146_v30 = vpop.eup %1145 }
  0xd3   :  { %v100_v31 = vmul.f32 300.0, %v1146_v30 }
  0xd4   :  { %v101_v29 = vadd.f32 100.0, %v99_v28  ;;  %v618_v28 = vstv %s1035_s9 }
  0xd5   :  { %v102_v32 = vadd.f32 100.0, %v100_v31 }
  0xd6   :  { %vm103_vm2 = vcmp.eq.f32.partialorder %v101_v29, 0.0  ;;  %v118_v46 = vmul.f32 %v117_v44, %v101_v29 }
  0xd7   :  { %v105_v34 = vsel %vm103_vm2, 1.0, %v1203_v33  ;;  %vm104_vm3 = vcmp.eq.f32.partialorder %v102_v32, 0.0  ;;  %v119_v50 = vmul.f32 %v117_v44, %v102_v32 }
  0xd8   :  { %v106_v35 = vsel %vm104_vm3, 1.0, %v1203_v33  ;;  %v120_v48 = vmax.f32 %v118_v46, 1e-05 }
  0xd9   :  { %v107_v36 = vmin.f32 %v105_v34, %v106_v35  ;;  %v121_v51 = vmax.f32 %v119_v50, 1e-05 }
  0xda   :  { %1147 = vlog2.f32 %v120_v48 }
  0xdb   :  { %v108_v37 = vrot.slane %v107_v36, 4  ;;  %1149 = vlog2.f32 %v121_v51 }
  0xdd   :  { %v109_v38 = vmin.f32 %v107_v36, %v108_v37 }
  0xdf   :  { %v110_v39 = vrot.slane %v109_v38, 2 }
  0xe0   :  { %v1148_v53 = vpop.eup %1147 }
  0xe1   :  { %v111_v40 = vmin.f32 %v109_v38, %v110_v39  ;;  %v1431_v54 = vmul.f32 0.6931472, %v1148_v53  ;;  %v1150_v57 = vpop.eup %1149 }
  0xe2   :  { %v1440_v61 = vmul.f32 0.6931472, %v1150_v57 }
  0xe3   :  { %v112_v41 = vrot.slane %v111_v40, 1  ;;  %v491_v60 = vmul.f32 %v1134_v56, %v1431_v54 }
  0xe4   :  { %v492_v0 = vmul.f32 %v1134_v56, %v1440_v61 }
  0xe5   :  { %v113_v42 = vmin.f32 %v111_v40, %v112_v41 }
  0xe7   :  { %1126 = vpush %v113_v42 }
 0x118   :  { %s1452_s6 = spop %1126 }
 0x119   :  { %p115_p0 = scmp.gt.f32.partialorder %s1452_s6, 0.0 }
 0x13e   :  { %v482_v58 = vpop.f32.mrf.mxu0 }
 0x13f   :  { %v483_v59 = vadd.f32 %v1133_v55, %v482_v58 }
 0x141   :  { %v493_v62 = vadd.f32 %v491_v60, %v483_v59 }
 0x143   :  { %v1446_v3 = vadd.f32 %v1135_v63, %v493_v62  ;;  %v1068_v62 = vld [vmem:[%s1609_s12 + $0x28] sm:$0xf] }
 0x145   :  { %1151 = vtanh.f32 %v1446_v3 }
 0x146   :  { %v484_v1 = vpop.f32.mrf.mxu0 }
 0x147   :  { %v485_v2 = vadd.f32 %v1133_v55, %v484_v1 }
 0x149   :  { %v494_v4 = vadd.f32 %v492_v0, %v485_v2  ;;  %v1123_v0 = vld [vmem:[%s1609_s12 + $0x2c] sm:$0xf]  ;;  %v1070_v2 = vld [vmem:[%s1609_s12 + $0x38] sm:$0xf0] }
 0x14b   :  { %v1448_v5 = vadd.f32 %v1135_v63, %v494_v4  ;;  %v1152_v6 = vpop.eup %1151  ;;  %v1125_v63 = vld [vmem:[%s1609_s12 + $0x34] sm:$0xf0]  ;;  %v1124_v4 = vld [vmem:[%s1609_s12 + $0x2c] sm:$0xf0] }
 0x14c   :  { %v1069_v1 = vor.u32 %v1125_v63, %v1068_v62 }
 0x14d   :  { %1153 = vtanh.f32 %v1448_v5 }
 0x153   :  { %v1154_v7 = vpop.eup %1153 }
 0x154   :  { %v516_v8 = vpack.c.bf16 %v1154_v7, %v1152_v6  ;;  %v1122_v7 = vld [vmem:[%s1609_s12 + $0x24] sm:$0xf] }
 0x156   :  { %1024 = vmatmul.msk.bf16.vlgmr.msrb.gmra.mxu1 %vm544_vm4, %v516_v8  ;;  %v1062_v8 = vld [vmem:[%s1609_s12 + $0x30] sm:$0xf0] }
 0x1d3   :  { %v557_v10 = vpop.f32.mrf.mxu1 }
 0x1d4   :  { %v558_v12 = vadd.f32 %v1462_v11, %v557_v10  ;;  %v1065_v10 = vor.u32 %v1122_v7, %v1062_v8  ;;  %v1204_v7 = vmov (%p115_p0), 0.0  }
 0x1d6   :  { %v565_v16 = vmul.f32 %v564_v13, %v558_v12  ;;  %v1121_v12 = vld [vmem:[%s1609_s12 + $0x14] sm:$0xf0]  ;;  %803 = vmatpush.bf16.msrb.mxu1 %v1065_v10 }
 0x1db   :  { %v559_v14 = vpop.f32.mrf.mxu1 }
 0x1dc   :  { %v560_v15 = vadd.f32 %v1462_v11, %v559_v14  ;;  %v1054_v14 = vld [vmem:[%s1609_s12 + $0x18] sm:$0xf0] }
 0x1de   :  { %v566_v17 = vmul.f32 %v564_v13, %v560_v15  ;;  %v1119_v13 = vld [vmem:[%s1609_s12 + $0xc] sm:$0xf]  ;;  %v1053_v15 = vor.u32 %v1121_v12, %v1052_v9 }
 0x1e0   :  { %v567_v18 = vpack.c.bf16 %v566_v17, %v565_v16 }
 0x1e2   :  { %1033 = vmatmul.msk.bf16.vlgmr.msrb.gmra.mxu2 %vm469_vm0, %v567_v18  ;;  %v1120_v18 = vld [vmem:[%s1609_s12 + $0xc] sm:$0xf0] }
 0x1e3   :  { %817 = vmatpush.bf16.msrb.mxu2 %v1069_v1 }
 0x1e7   :  { %818 = vmatpush.bf16.msrb.mxu2 %v1053_v15 }
 0x265   :  { %v592_v19 = vpop.f32.mrf.mxu2 }
 0x266   :  { %v593_v20 = vadd.f32 %v592_v19, %v1446_v3  ;;  %v1118_v19 = vld [vmem:[%s1609_s12 + $0x4] sm:$0xf] }
 0x268   :  { %1155 = vtanh.f32 %v593_v20 }
 0x26d   :  { %v594_v21 = vpop.f32.mrf.mxu2 }
 0x26e   :  { %v595_v22 = vadd.f32 %v594_v21, %v1448_v5  ;;  %v1156_v23 = vpop.eup %1155  ;;  %v1046_v21 = vld [vmem:[%s1609_s12 + $0x10] sm:$0xf0] }
 0x270   :  { %1157 = vtanh.f32 %v595_v22  ;;  %v1049_v22 = vor.u32 %v1118_v19, %v1046_v21 }
 0x272   :  { %804 = vmatpush.bf16.msrb.mxu1 %v1049_v22 }
 0x276   :  { %v1158_v24 = vpop.eup %1157 }
 0x277   :  { %v599_v25 = vpack.c.bf16 %v1158_v24, %v1156_v23 }
 0x279   :  { %1034 = vmatmul.msk.bf16.vlgmr.msrb.gmra.mxu3 %vm544_vm4, %v599_v25  ;;  %v706_v25 = vstv %s1041_s18 }
 0x2fc   :  { %v612_v26 = vpop.f32.mrf.mxu3 }
 0x2fd   :  { %v613_v27 = vadd.f32 %v1462_v11, %v612_v26 }
 0x2ff   :  { %v619_v30 = vmul.f32 %v618_v28, %v613_v27 }
 0x301   :  { %v621_v33 = vsub.f32 %v565_v16, %v619_v30  ;;  %v1057_v16 = vor.u32 %v1119_v13, %v1054_v14 }
 0x304   :  { %v614_v29 = vpop.f32.mrf.mxu3 }
 0x305   :  { %v615_v31 = vadd.f32 %v1462_v11, %v614_v29 }
 0x307   :  { %v620_v32 = vmul.f32 %v618_v28, %v615_v31 }
 0x309   :  { %v622_v34 = vsub.f32 %v566_v17, %v620_v32  ;;  %v1044_v17 = vld [vmem:[%s1609_s12] sm:$0xf] }
 0x30a   :  { %v1045_v20 = vor.u32 %v1120_v18, %v1044_v17 }
 0x30b   :  { %v623_v35 = vpack.c.bf16 %v622_v34, %v621_v33 }
 0x30d   :  { %1036 = vmatmul.msk.bf16.vlgmr.msra.gmra.mxu0 %vm469_vm0, %v623_v35 }
 0x38a   :  { %v636_v36 = vpop.f32.mrf.mxu0 }
 0x38b   :  { %v637_v37 = vadd.f32 %v636_v36, %v1446_v3 }
 0x38d   :  { %1159 = vtanh.f32 %v637_v37 }
 0x392   :  { %v638_v38 = vpop.f32.mrf.mxu0 }
 0x393   :  { %v639_v39 = vadd.f32 %v638_v38, %v1448_v5  ;;  %v1160_v40 = vpop.eup %1159 }
 0x395   :  { %1161 = vtanh.f32 %v639_v39 }
 0x39b   :  { %v1162_v41 = vpop.eup %1161 }
 0x39c   :  { %v643_v42 = vpack.c.bf16 %v1162_v41, %v1160_v40 }
 0x39e   :  { %1037 = vmatmul.msk.bf16.vlgmr.msra.gmra.mxu1 %vm544_vm4, %v643_v42 }
 0x41b   :  { %v656_v43 = vpop.f32.mrf.mxu1 }
 0x41c   :  { %v657_v44 = vadd.f32 %v1462_v11, %v656_v43 }
 0x41e   :  { %v663_v47 = vmul.f32 %v662_v45, %v657_v44 }
 0x420   :  { %v665_v50 = vsub.f32 %v621_v33, %v663_v47 }
 0x423   :  { %v658_v46 = vpop.f32.mrf.mxu1 }
 0x424   :  { %v659_v48 = vadd.f32 %v1462_v11, %v658_v46 }
 0x426   :  { %v664_v49 = vmul.f32 %v662_v45, %v659_v48 }
 0x428   :  { %v666_v51 = vsub.f32 %v622_v34, %v664_v49 }
 0x42a   :  { %v667_v52 = vpack.c.bf16 %v666_v51, %v665_v50 }
 0x42c   :  { %1039 = vmatmul.msk.bf16.vlgmr.msra.gmra.mxu2 %vm469_vm0, %v667_v52 }
 0x4af   :  { %v680_v53 = vpop.f32.mrf.mxu2 }
 0x4b0   :  { %v681_v55 = vadd.f32 %v680_v53, %v1446_v3  ;;  %v1060_v3 = vld [vmem:[%s1609_s12 + $0x20] sm:$0xf] }
 0x4b1   :  { %v1061_v6 = vor.u32 %v1124_v4, %v1060_v3 }
 0x4b2   :  { %1163 = vtanh.f32 %v681_v55 }
 0x4b3   :  { %789 = vmatpush.bf16.msrb.mxu0 %v1061_v6 }
 0x4b7   :  { %v682_v56 = vpop.f32.mrf.mxu2  ;;  %790 = vmatpush.bf16.msrb.mxu0 %v1045_v20 }
 0x4b8   :  { %v683_v57 = vadd.f32 %v682_v56, %v1448_v5  ;;  %v1164_v58 = vpop.eup %1163  ;;  %v1073_v5 = vor.u32 %v1123_v0, %v1070_v2 }
 0x4ba   :  { %1165 = vtanh.f32 %v683_v57  ;;  %831 = vmatpush.bf16.msrb.mxu3 %v1073_v5 }
 0x4be   :  { %832 = vmatpush.bf16.msrb.mxu3 %v1057_v16 }
 0x4c0   :  { %v1166_v59 = vpop.eup %1165 }
 0x4c1   :  { %v687_v60 = vpack.c.bf16 %v1166_v59, %v1164_v58 }
 0x4c3   :  { %1040 = vmatmul.msk.bf16.vlgmr.msra.gmra.mxu3 %vm544_vm4, %v687_v60 }
 0x546   :  { %v700_v23 = vpop.f32.mrf.mxu3 }
 0x547   :  { %v701_v24 = vadd.f32 %v1462_v11, %v700_v23 }
 0x549   :  { %v707_v26 = vmul.f32 %v706_v25, %v701_v24 }
 0x54b   :  { %v709_v29 = vsub.f32 %v665_v50, %v707_v26 }
 0x54d   :  { %1167 = vtanh.f32 %v709_v29 }
 0x54e   :  { %v702_v27 = vpop.f32.mrf.mxu3 }
 0x54f   :  { %v703_v28 = vadd.f32 %v1462_v11, %v702_v27  ;;  %v722_v11 = vld [vmem:[%s1610_s13] sm:$0xf] }
 0x550   :  { %v724_v35 = vperm.slane %v722_v11, 0  ;;  %v725_v36 = vperm.slane %v722_v11, 1  ;;  %v726_v43 = vperm.slane %v722_v11, 2  ;;  %v727_v44 = vperm.slane %v722_v11, 3 }
 0x551   :  { %v708_v30 = vmul.f32 %v706_v25, %v703_v28 }
 0x552   :  { %v732_v37 = vmul.f32 %v724_v35, %v1431_v54  ;;  %v733_v38 = vmul.f32 %v725_v36, %v1431_v54  ;;  %v734_v45 = vmul.f32 %v726_v43, %v1431_v54  ;;  %v735_v46 = vmul.f32 %v727_v44, %v1431_v54 }
 0x553   :  { %v710_v31 = vsub.f32 %v666_v51, %v708_v30  ;;  %v1168_v32 = vpop.eup %1167  ;;  %v736_v49 = vmul.f32 %v724_v35, %v1440_v61  ;;  %v737_v50 = vmul.f32 %v725_v36, %v1440_v61  ;;  %v738_v54 = vmul.f32 %v726_v43, %v1440_v61 }
 0x554   :  { %v739_v60 = vmul.f32 %v727_v44, %v1440_v61 }
 0x555   :  { %1169 = vtanh.f32 %v710_v31 }
 0x55b   :  { %v1170_v33 = vpop.eup %1169 }
 0x55c   :  { %v713_v34 = vpack.c.bf16 %v1170_v33, %v1168_v32 }
 0x55e   :  { %1074 = vmatmul.msk.bf16.vlgmr.msrb.gmra.mxu0 %vm469_vm0, %v713_v34  ;;  %1075 = vmatmul.msk.bf16.vlgmr.msrb.gmra.mxu1 %vm469_vm0, %v713_v34 }
 0x55f   :  { %1076 = vmatmul.msk.bf16.vlgmr.msrb.gmra.mxu2 %vm469_vm0, %v713_v34  ;;  %1077 = vmatmul.msk.bf16.vlgmr.msrb.gmra.mxu3 %vm469_vm0, %v713_v34 }
 0x5db   :  { %v792_v39 = vpop.f32.mrf.mxu0  ;;  %v806_v40 = vpop.f32.mrf.mxu1 }
 0x5dc   :  { %v793_v41 = vadd.f32 %v792_v39, %v732_v37  ;;  %v807_v42 = vadd.f32 %v806_v40, %v733_v38 }
 0x5de   :  { %1171 = vtanh.f32 %v793_v41 }
 0x5df   :  { %1173 = vtanh.f32 %v807_v42 }
 0x5e2   :  { %v820_v47 = vpop.f32.mrf.mxu2  ;;  %v834_v48 = vpop.f32.mrf.mxu3 }
 0x5e3   :  { %v821_v51 = vadd.f32 %v820_v47, %v734_v45  ;;  %v835_v52 = vadd.f32 %v834_v48, %v735_v46  ;;  %v794_v53 = vpop.f32.mrf.mxu0  ;;  %v808_v55 = vpop.f32.mrf.mxu1 }
 0x5e4   :  { %v1172_v56 = vpop.eup %1171  ;;  %v795_v57 = vadd.f32 %v794_v53, %v736_v49  ;;  %v809_v58 = vadd.f32 %v808_v55, %v737_v50 }
 0x5e5   :  { %v1174_v59 = vpop.eup %1173  ;;  %847 = vst [vmem:[%s1611_s14] sm:$0xff] %v1172_v56  ;;  %1175 = vtanh.f32 %v821_v51 }
 0x5e6   :  { %848 = vst [vmem:[%s1611_s14 + $0x8] sm:$0xff] %v1174_v59  ;;  %1177 = vtanh.f32 %v835_v52 }
 0x5e7   :  { %1179 = vtanh.f32 %v795_v57  ;;  %858 = vst [vmem:[%s1611_s14] sm:$0xff] (%p115_p0), %v1204_v7 }
 0x5e8   :  { %1181 = vtanh.f32 %v809_v58  ;;  %859 = vst [vmem:[%s1611_s14 + $0x8] sm:$0xff] (%p115_p0), %v1204_v7 }
 0x5ea   :  { %v822_v62 = vpop.f32.mrf.mxu2  ;;  %v836_v63 = vpop.f32.mrf.mxu3 }
 0x5eb   :  { %v1176_v0 = vpop.eup %1175  ;;  %v823_v1 = vadd.f32 %v822_v62, %v738_v54  ;;  %v837_v2 = vadd.f32 %v836_v63, %v739_v60 }
 0x5ec   :  { %v1178_v3 = vpop.eup %1177  ;;  %849 = vst [vmem:[%s1611_s14 + $0x10] sm:$0xff] %v1176_v0 }
 0x5ed   :  { %v1180_v4 = vpop.eup %1179  ;;  %850 = vst [vmem:[%s1611_s14 + $0x18] sm:$0xff] %v1178_v3  ;;  %1183 = vtanh.f32 %v823_v1 }
 0x5ee   :  { %v1182_v5 = vpop.eup %1181  ;;  %851 = vst [vmem:[%s1611_s14 + $0x20] sm:$0xff] %v1180_v4  ;;  %1185 = vtanh.f32 %v837_v2 }
 0x5ef   :  { %852 = vst [vmem:[%s1611_s14 + $0x28] sm:$0xff] %v1182_v5 }
 0x5f0   :  { %860 = vst [vmem:[%s1611_s14 + $0x10] sm:$0xff] (%p115_p0), %v1204_v7 }
 0x5f1   :  { %857 = sbr.rel (!%p115_p0) target bundleno = 1528 (0x5f8), region = 65  ;;  %861 = vst [vmem:[%s1611_s14 + $0x18] sm:$0xff] (%p115_p0), %v1204_v7 }
 0x5f2   :  { %862 = vst [vmem:[%s1611_s14 + $0x20] sm:$0xff] (%p115_p0), %v1204_v7 }
 0x5f3   :  { %v1184_v61 = vpop.eup %1183  ;;  %863 = vst [vmem:[%s1611_s14 + $0x28] sm:$0xff] (%p115_p0), %v1204_v7 }
 0x5f4   :  { %v1186_v6 = vpop.eup %1185  ;;  %853 = vst [vmem:[%s1611_s14 + $0x30] sm:$0xff] %v1184_v61 }
 0x5f5   :  { %854 = vst [vmem:[%s1611_s14 + $0x38] sm:$0xff] %v1186_v6 }
 0x5f6   :  { %864 = vst [vmem:[%s1611_s14 + $0x30] sm:$0xff] %v1204_v7 }
 0x5f7   :  { %865 = vst [vmem:[%s1611_s14 + $0x38] sm:$0xff] %v1204_v7 }
 0x5f8 PF:  { %870 = vsyncpa [#allocation4], 1 }

</bundles_post_ra>
